<compile_context>
chip_gen: v6e
topology: v6e:2x2x1
jax: 0.10.0
libtpu: 0.0.40
codegen_flags: <defaults>
</compile_context>

<pallas_src>
import jax
import jax.numpy as jnp
from jax.experimental import pallas as pl
from jax.experimental.pallas import tpu as pltpu


def _identity_layerstack_kernel(x_ref, o_ref):
    # "for layer in self.layers: x = layer(x)" with layers == []  ->  x unchanged.
    o_ref[...] = x_ref[...]


# Per-block VMEM byte budget for the tiled path:
#   4 MiB/block * 2 pipeline buffers * 2 refs (in + out) = 16 MiB peak,
# comfortably under the scoped limit requested below on every generation
# (v5e/v6e: 128 MiB physical; v7x: 64 MiB physical / 32 MiB scoped default).
_BLOCK_BYTES_CAP = 4 * 1024 * 1024
# Below this total size, skip the grid entirely: one whole-array VMEM block.
_SMALL_WHOLE_ARRAY_BYTES = 2 * 1024 * 1024
# Explicit scoped-VMEM limit (v5e's default is only 16 MiB; raise it everywhere).
_VMEM_LIMIT_BYTES = 32 * 1024 * 1024


def _passthrough_whole_array(x2d):
    """Small slab: single un-tiled block -> one DMA in / DMA out, no grid overhead."""
    return pl.pallas_call(
        _identity_layerstack_kernel,
        out_shape=jax.ShapeDtypeStruct(x2d.shape, x2d.dtype),
        in_specs=[pl.BlockSpec(memory_space=pltpu.MemorySpace.VMEM)],
        out_specs=pl.BlockSpec(memory_space=pltpu.MemorySpace.VMEM),
        input_output_aliases={0: 0},  # no second HBM buffer
    )(x2d)


def _passthrough_tiled(x2d):
    """Large slab: 1-D row grid with large, lane-dense (TR, C) blocks."""
    R, C = x2d.shape
    itemsize = jnp.dtype(x2d.dtype).itemsize
    row_bytes = C * itemsize
    # Largest row tile (multiple of 8 sublanes) that fits the per-block budget.
    tr = max(_BLOCK_BYTES_CAP // row_bytes, 1)
    tr = (tr // 8) * 8
    if tr == 0 or tr >= R:
        tr = R  # full-extent block along rows is always a legal block shape
    grid = (pl.cdiv(R, tr),)
    return pl.pallas_call(
        _identity_layerstack_kernel,
        out_shape=jax.ShapeDtypeStruct((R, C), x2d.dtype),
        grid_spec=pltpu.PrefetchScalarGridSpec(
            num_scalar_prefetch=0,
            grid=grid,
            # Last block dim == full C: lane-dense blocks -> unmasked stores,
            # and the grid collapses to 1-D (row blocks only).
            in_specs=[pl.BlockSpec((tr, C), lambda i: (i, 0))],
            out_specs=pl.BlockSpec((tr, C), lambda i: (i, 0)),
        ),
        input_output_aliases={0: 0},  # identity copy: reuse the input HBM buffer
        compiler_params=pltpu.CompilerParams(
            dimension_semantics=("parallel",),  # v7x: shard row grid over 2 TCs
            vmem_limit_bytes=_VMEM_LIMIT_BYTES,
        ),
    )(x2d)


def pallas_apply_empty_layerstack(x):
    """Materialize the (empty) layer-stack application on-TPU for an NCHW tensor."""
    B, C, H, W = x.shape
    # View as a 2-D slab [B*C, H*W] so the last dim maps onto the 128-wide lane axis.
    x2d = x.reshape(B * C, H * W)
    total_bytes = x2d.size * jnp.dtype(x2d.dtype).itemsize
    if total_bytes <= _SMALL_WHOLE_ARRAY_BYTES:
        y2d = _passthrough_whole_array(x2d)
    else:
        y2d = _passthrough_tiled(x2d)
    return y2d.reshape(B, C, H, W)


class NetBasePallas:
    """JAX/Pallas mirror of pytorchClassifiers.NetBase (forward pass only)."""

    def __init__(self, n_inputs, n_outputs, *args, **kwargs):
        self.name = ""
        # Base class creates no parameters; subclasses would append
        # Pallas-backed callables here.
        self.layers = []

    def forward(self, x):
        # Highest-value optimization: an empty layer stack is the identity, so
        # launch no kernel and move no HBM bytes.
        if not self.layers:
            return x
        for layer in self.layers:
            x = layer(x)
        return x

    def __call__(self, x):
        return self.forward(x)


if __name__ == "__main__":
    key = jax.random.PRNGKey(0)
    B, C, H, W = 2, 4, 16, 16  # small NCHW input, matches PyTorch conv convention
    x = jax.random.normal(key, (B, C, H, W), dtype=jnp.float32)
    # Independent reference with identical values (same key), so the check stays
    # valid even if XLA donates x's buffer through input_output_aliases.
    x_expected = jax.random.normal(key, (B, C, H, W), dtype=jnp.float32)

    net = NetBasePallas(n_inputs=C * H * W, n_outputs=10)

    # Base-class forward: empty layer stack -> identity, zero bytes moved.
    y_net = net(x)
    assert y_net is x

    # Exercise the Pallas pass-through kernel once and verify it is an exact copy.
    y = pallas_apply_empty_layerstack(x)
    y = jax.block_until_ready(y)

    assert y.shape == x_expected.shape and y.dtype == x_expected.dtype
    assert bool(jnp.all(y == x_expected))
    print("KERNEL_OK")
</pallas_src>

<mosaic_0001>
module attributes {stable_mosaic.version = 11 : i64} {
  func.func @_identity_layerstack_kernel(%arg0: memref<8x256xf32, #tpu.memory_space<vmem>>, %arg1: memref<8x256xf32, #tpu.memory_space<vmem>>) attributes {dimension_semantics = [], scalar_prefetch = 0 : i64, scratch_operands = 0 : i64, tpu.core_type = #tpu.core_type<tc>} {
    %c0 = arith.constant 0 : index
    %c0_0 = arith.constant 0 : index
    %0 = vector.load %arg0[%c0, %c0_0] : memref<8x256xf32, #tpu.memory_space<vmem>>, vector<8x256xf32>
    %c0_1 = arith.constant 0 : index
    %c0_2 = arith.constant 0 : index
    %1 = vector.load %arg1[%c0_1, %c0_2] : memref<8x256xf32, #tpu.memory_space<vmem>>, vector<8x256xf32>
    tpu.vector_store %arg1[%c0_1, %c0_2], %0 {strides = array<i32>} : memref<8x256xf32, #tpu.memory_space<vmem>>, vector<8x256xf32>,
    return
  }
}

</mosaic_0001>

<bundles_post_ra>
// kernel: tpu_custom_call.1
= control target key start
LH: loop header
LB: loop body
LE: loop exit
PB: predicated region body
PF: predicated region fallthrough
CT: control target
= control target key end

     0   :  { %6 = vsyncpa [#allocation3], 0  ;;  %s104_s0 = inlined_call_operand.hbm [shape: f32[8,256], index: 0, kind: input, shape index: {}, may-alias: {0,1}]   ;;  %s105_s1 = inlined_call_operand.hbm [shape: f32[8,256], index: 1, kind: output, shape index: {}, may-alias: {0,1}]  }
   0x1   :  { %7 = vsyncpa [#allocation4], 0  ;;  %s86_s6 = smov [#allocation2]  }
   0x2   :  { %s14_s7 = sshll.u32 %s86_s6, 4  ;;  %s15_s7 = int_to_ptr.vmem [resolvable:$true] %s14_s7 }
   0x3   :  { %s50_s8 = scalar_lea.vmem %s15_s7, 256  ;;  %p55_p1 = scmp.lt.s32.totalorder %s15_s7, %s15_s7 }
   0x4   :  { %p51_p0 = scmp.ne.s32.totalorder %s15_s7, %s50_s8  ;;  %p56_p2 = scmp.lt.s32.totalorder %s50_s8, %s50_s8 }
   0x6   :  { %p57_p3 = por %p56_p2, %p55_p1 }
   0x8   :  { %p58_p4 = pnand %p57_p3, %p51_p0 }
   0xa   :  { %61 = shalt.err (!%p58_p4)
}
   0xb   :  { %17 = dma.hbm_to_vmem [thread:$0]  %s104_s0, 256, %s15_s7, [#allocation3]  }
   0xc   :  { %82 = dma.done.wait [#allocation3], 256  }
   0xd   :  { %83 = vsyncadd [#allocation3], 4294967040  ;;  %s87_s11 = smov [#allocation5]   ;;  %v21_v0 = vld [vmem:[#allocation2] sm:$0xff]  ;;  %v22_v1 = vld [vmem:[#allocation2 + $0x8] sm:$0xff] }
   0xe   :  { %s31_s12 = sshll.u32 %s87_s11, 4  ;;  %23 = vst [vmem:[#allocation5] sm:$0xff] %v21_v0  ;;  %24 = vst [vmem:[#allocation5 + $0x8] sm:$0xff] %v22_v1  ;;  %s32_s12 = int_to_ptr.vmem [resolvable:$true] %s31_s12 }
   0xf   :  { %s62_s13 = scalar_lea.vmem %s32_s12, 256  ;;  %p67_p6 = scmp.lt.s32.totalorder %s32_s12, %s32_s12 }
  0x10   :  { %p63_p5 = scmp.ne.s32.totalorder %s32_s12, %s62_s13  ;;  %p68_p7 = scmp.lt.s32.totalorder %s62_s13, %s62_s13 }
  0x12   :  { %p69_p8 = por %p68_p7, %p67_p6 }
  0x14   :  { %p70_p9 = pnand %p69_p8, %p63_p5 }
  0x16   :  { %73 = shalt.err (!%p70_p9)
}
  0x17   :  { %34 = dma.vmem_to_hbm [thread:$0]  %s32_s12, 256, %s105_s1, [#allocation4]  }
  0x18   :  { %84 = dma.done.wait [#allocation4], 256  }
  0x19   :  { %85 = vsyncadd [#allocation4], 4294967040 }
  0x1a   :  { %38 = vsyncpa [#allocation3], 1 }
  0x1b   :  { %39 = vsyncpa [#allocation4], 1 }

</bundles_post_ra>
